<compile_context>
chip_gen: v7x
topology: tpu7x:2x2x1
jax: 0.10.0
libtpu: 0.0.40
codegen_flags: <defaults>
</compile_context>

<pallas_src>
import numpy as np
import jax
import jax.numpy as jnp
from jax.experimental import pallas as pl
from jax.experimental.pallas import tpu as pltpu

# ----------------------------- configuration ---------------------------------
NUM_CLASSES = 8          # 8 ShapenetObj entries in the reference module
FFD_DIM = 12             # synthetic FFD coefficient dimension per class
HIDDEN = 128             # derenderer hidden width (lane-dense)
HEAD_DIM = NUM_CLASSES + 2 + 2 + 1 + 1 + NUM_CLASSES * FFD_DIM   # = 110
HEAD_PAD = 128           # lane-dense output slab width (110 heads + 18 zero pad)

TM_MAX = 128             # batch (sublane) tile cap; keeps num_m>=2 on v7x for B>=256
TK_FALLBACK = 2048       # K tile for the (large d_img) K-tiled fallback
FULL_K_VMEM_BUDGET = 40 * 1024 * 1024   # conservative vs v7x's 64 MiB physical VMEM

# head layout inside the [B, HEAD_PAD] output slab:
#   [0:8)    class logits
#   [8:10)   theta_deltas
#   [10:12)  translation2ds
#   [12:13)  log_scales
#   [13:14)  log_depths
#   [14:110) ffd_coeffs (NUM_CLASSES * FFD_DIM)
#   [110:128) zero padding (w2/b2 zero-padded)


def _round_up(x, m):
    return (x + m - 1) // m * m


# ----------------------------- kernels ----------------------------------------
def _fullk_kernel(bias_ref, img_ref, w1_ref, w2_ref, b2_ref, out_ref):
    # Single resident-weight GEMM: f32 image rows cast to bf16 at the MXU input,
    # f32 accumulation, ReLU, second (tiny) GEMM, one lane-dense 128-wide store.
    h = bias_ref[...] + jnp.dot(img_ref[...].astype(jnp.bfloat16), w1_ref[...],
                                preferred_element_type=jnp.float32)
    h = jnp.maximum(h, 0.0)
    out_ref[...] = (jnp.dot(h.astype(jnp.bfloat16), w2_ref[...],
                            preferred_element_type=jnp.float32) + b2_ref[...])


def _ktiled_kernel(bias_ref, img_ref, w1_ref, w2_ref, b2_ref, out_ref, acc_ref):
    # Fallback for d_img too large for full-K residency: K innermost, f32 VMEM
    # accumulator, init at k==0, epilogue at k==last.
    k = pl.program_id(1)

    @pl.when(k == 0)
    def _init():
        acc_ref[...] = bias_ref[...]

    acc_ref[...] += jnp.dot(img_ref[...].astype(jnp.bfloat16), w1_ref[...],
                            preferred_element_type=jnp.float32)

    @pl.when(k == pl.num_programs(1) - 1)
    def _epilogue():
        h = jnp.maximum(acc_ref[...], 0.0)
        out_ref[...] = (jnp.dot(h.astype(jnp.bfloat16), w2_ref[...],
                                preferred_element_type=jnp.float32) + b2_ref[...])


# ----------------------------- params -----------------------------------------
def init_params(key, d_img):
    k1, k2, k3, k4, k5 = jax.random.split(key, 5)
    return dict(
        w1_img=0.02 * jax.random.normal(k1, (d_img, HIDDEN), jnp.float32),
        w1_roi=0.02 * jax.random.normal(k2, (4, HIDDEN), jnp.float32),
        b1=0.01 * jax.random.normal(k3, (1, HIDDEN), jnp.float32),
        w2=0.02 * jax.random.normal(k4, (HIDDEN, HEAD_DIM), jnp.float32),
        b2=0.01 * jax.random.normal(k5, (1, HEAD_DIM), jnp.float32),
    )


# ----------------------------- MLP (pallas) ------------------------------------
def _derenderer_mlp(img_flat, roi_bias, w1_bf16, w2_pad, b2_pad):
    """img_flat [B, d_img] f32, roi_bias [B, HIDDEN] f32 -> [B, HEAD_PAD] f32."""
    B, d_img = img_flat.shape
    TM = min(TM_MAX, _round_up(B, 8))
    b_pad = _round_up(B, TM)
    if b_pad != B:
        img_flat = jnp.pad(img_flat, ((0, b_pad - B), (0, 0)))
        roi_bias = jnp.pad(roi_bias, ((0, b_pad - B), (0, 0)))
    num_m = b_pad // TM

    # shared VMEM terms (bias/out/w2/b2 double buffers + acc scratch)
    bytes_shared = (2 * HIDDEN * HEAD_PAD * 2 + 2 * HEAD_PAD * 4
                    + 2 * TM * HIDDEN * 4 + 2 * TM * HEAD_PAD * 4
                    + TM * HIDDEN * 4)
    fullk_vmem = 2 * d_img * HIDDEN * 2 + 2 * TM * d_img * 4 + bytes_shared
    use_fullk = fullk_vmem <= FULL_K_VMEM_BUDGET

    if use_fullk:
        cost = pl.CostEstimate(
            flops=2 * b_pad * d_img * HIDDEN + 2 * b_pad * HIDDEN * HEAD_PAD,
            transcendentals=0,
            bytes_accessed=(img_flat.size * 4 + w1_bf16.size * 2 + w2_pad.size * 2
                            + roi_bias.size * 4 + b2_pad.size * 4
                            + b_pad * HEAD_PAD * 4))
        vmem_limit = int(min(max(fullk_vmem * 5 // 4, 32 * 1024 * 1024),
                             48 * 1024 * 1024))
        out = pl.pallas_call(
            _fullk_kernel,
            grid_spec=pltpu.PrefetchScalarGridSpec(
                num_scalar_prefetch=0,
                grid=(num_m,),
                in_specs=[
                    pl.BlockSpec((TM, HIDDEN), lambda m: (m, 0)),        # roi bias (f32)
                    pl.BlockSpec((TM, d_img), lambda m: (m, 0)),         # image rows (f32)
                    pl.BlockSpec((d_img, HIDDEN), lambda m: (0, 0)),     # w1 bf16 (resident)
                    pl.BlockSpec((HIDDEN, HEAD_PAD), lambda m: (0, 0)),  # w2 bf16 (padded)
                    pl.BlockSpec((1, HEAD_PAD), lambda m: (0, 0)),       # b2 f32 (padded)
                ],
                out_specs=pl.BlockSpec((TM, HEAD_PAD), lambda m: (m, 0)),
            ),
            out_shape=jax.ShapeDtypeStruct((b_pad, HEAD_PAD), jnp.float32),
            compiler_params=pltpu.CompilerParams(
                dimension_semantics=("parallel",),
                vmem_limit_bytes=vmem_limit),
            cost_estimate=cost,
        )(roi_bias, img_flat, w1_bf16, w2_pad, b2_pad)
    else:
        # K-tiled streaming fallback for very large d_img (w1 not VMEM-resident).
        TK = TK_FALLBACK
        d_pad = _round_up(d_img, TK)
        # TODO(synk): this pad re-materializes the (huge-d_img) image once in f32;
        #             only taken when w1_img cannot be kept VMEM-resident.
        img_p = jnp.pad(img_flat, ((0, 0), (0, d_pad - d_img)))
        w1_p = jnp.pad(w1_bf16, ((0, d_pad - d_img), (0, 0)))
        num_k = d_pad // TK
        ktiled_vmem = 2 * TK * HIDDEN * 2 + 3 * TM * TK * 4 + bytes_shared
        vmem_limit = int(min(max(ktiled_vmem * 5 // 4, 32 * 1024 * 1024),
                             48 * 1024 * 1024))
        cost = pl.CostEstimate(
            flops=2 * b_pad * d_pad * HIDDEN + 2 * b_pad * HIDDEN * HEAD_PAD,
            transcendentals=0,
            bytes_accessed=(img_p.size * 4 + w1_p.size * 2 * num_m + w2_pad.size * 2
                            + roi_bias.size * 4 + b2_pad.size * 4
                            + b_pad * HEAD_PAD * 4))
        out = pl.pallas_call(
            _ktiled_kernel,
            grid_spec=pltpu.PrefetchScalarGridSpec(
                num_scalar_prefetch=0,
                grid=(num_m, num_k),
                in_specs=[
                    pl.BlockSpec((TM, HIDDEN), lambda m, k: (m, 0)),        # roi bias
                    pl.BlockSpec((TM, TK), lambda m, k: (m, k),
                                 pipeline_mode=pl.Buffered(3)),             # image tile
                    pl.BlockSpec((TK, HIDDEN), lambda m, k: (k, 0)),        # w1 tile
                    pl.BlockSpec((HIDDEN, HEAD_PAD), lambda m, k: (0, 0)),  # w2
                    pl.BlockSpec((1, HEAD_PAD), lambda m, k: (0, 0)),       # b2
                ],
                out_specs=pl.BlockSpec((TM, HEAD_PAD), lambda m, k: (m, 0)),
                scratch_shapes=[pltpu.VMEM((TM, HIDDEN), jnp.float32)],
            ),
            out_shape=jax.ShapeDtypeStruct((b_pad, HEAD_PAD), jnp.float32),
            compiler_params=pltpu.CompilerParams(
                dimension_semantics=("parallel", "arbitrary"),
                vmem_limit_bytes=vmem_limit),
            cost_estimate=cost,
        )(roi_bias, img_p, w1_p, w2_pad, b2_pad)

    return out[:B]


# ----------------------------- forward ----------------------------------------
def derenderer3d_forward(images, roi_norms, focals, params,
                         image_size=64, render_size=64):
    """Eval-mode forward pass of Derenderer3d (analytic parts)."""
    B = images.shape[0]
    roi = roi_norms.astype(jnp.float32)
    mroi = (roi[:, 2:4] + roi[:, 0:2]) / 2.0                    # [B, 2]
    droi = roi[:, 2:4] - roi[:, 0:2]                            # [B, 2]
    roi_feats = jnp.concatenate([mroi, droi], axis=1)           # [B, 4]

    img_flat = images.reshape(B, -1).astype(jnp.float32)        # [B, C*H*W]

    # tiny [B,4]x[4,128] roi contribution + bias precomputed here (one lane-dense
    # f32 kernel input; replaces the degenerate lane-4 / sublane-4 operands).
    roi_bias = roi_feats @ params["w1_roi"] + params["b1"]      # [B, HIDDEN]

    w1_bf16 = params["w1_img"].astype(jnp.bfloat16)
    w2_pad = jnp.pad(params["w2"],
                     ((0, 0), (0, HEAD_PAD - HEAD_DIM))).astype(jnp.bfloat16)
    b2_pad = jnp.pad(params["b2"], ((0, 0), (0, HEAD_PAD - HEAD_DIM)))

    out = _derenderer_mlp(img_flat, roi_bias, w1_bf16, w2_pad, b2_pad)

    heads = out[:, :HEAD_DIM]
    logits = heads[:, :NUM_CLASSES]
    theta_deltas = heads[:, NUM_CLASSES:NUM_CLASSES + 2]
    translation2ds = heads[:, NUM_CLASSES + 2:NUM_CLASSES + 4]
    log_scales = heads[:, NUM_CLASSES + 4:NUM_CLASSES + 5]
    log_depths = heads[:, NUM_CLASSES + 5:NUM_CLASSES + 6]
    ffd_coeffs = heads[:, NUM_CLASSES + 6:].reshape(B, NUM_CLASSES, FFD_DIM)

    # class softmax + render()'s analytic pose math: a handful of elementwise ops
    # on [B, <=8] tensors -- left to XLA so everything fuses into one tiny kernel.
    class_probs = jax.nn.softmax(logits, axis=1)
    thetas = jnp.arctan2(theta_deltas[:, 1:2], theta_deltas[:, 0:1])   # [B, 1]
    zeros = jnp.zeros_like(thetas)
    rotations = jnp.concatenate(
        [jnp.cos(thetas / 2.0), zeros, jnp.sin(thetas / 2.0), zeros], axis=1)
    areas = jnp.maximum(droi[:, 0:1] * droi[:, 1:2], 1e-12)   # guard degenerate rois
    scales = jnp.exp(log_scales)
    depths = jnp.sqrt(jnp.exp(log_depths) / areas)
    center2ds = mroi + translation2ds * droi
    tu = jnp.concatenate(
        [center2ds[:, 1:2], -center2ds[:, 0:1], -jnp.ones_like(thetas)], axis=1)
    tu = tu / jnp.sqrt(jnp.sum(tu * tu, axis=1, keepdims=True))
    translations = depths * tu
    alphas = -(thetas - jnp.arctan(translations[:, 0:1] / translations[:, 2:3]))
    alphas = jnp.remainder(alphas + np.pi, 2.0 * np.pi) - np.pi
    # eval path: log(max class prob), computed stably from logits
    class_log_probs = (jnp.max(logits, axis=1)
                       - jax.scipy.special.logsumexp(logits, axis=1))
    focals_f = focals.astype(jnp.float32)
    zoom_tos = render_size / (2.0 * focals_f)

    blob = {
        "_roi_norms": roi_norms,
        "_mroi_norms": mroi,
        "_droi_norms": droi,
        "_focals": focals,
        "_theta_deltas": theta_deltas,
        "_translation2ds": translation2ds,
        "_log_scales": log_scales,
        "_log_depths": log_depths,
        "_class_probs": class_probs,
        "_ffd_coeffs": ffd_coeffs,
        "_thetas": thetas,
        "_alphas": alphas,
        "_rotations": rotations,
        "_scales": scales,
        "_depths": depths,
        "_center2ds": center2ds,
        "_translations": translations,
        "_class_log_probs": class_log_probs,
        "_zoom_tos": zoom_tos,
        # TODO(synk): '_zooms', '_masks', '_normals', '_depth_maps' require the
        #             FFD + PerspectiveTransform + neural mesh Renderer pipeline.
    }
    return blob


# ----------------------------- demo ------------------------------------------
if __name__ == "__main__":
    key = jax.random.PRNGKey(0)
    B, C, H, W = 2, 3, 16, 16
    k_img, k_lo, k_hi = jax.random.split(key, 3)

    images = jax.random.normal(k_img, (B, C, H, W), jnp.float32)
    lo = jax.random.uniform(k_lo, (B, 2), jnp.float32, minval=0.05, maxval=0.40)
    hi = jax.random.uniform(k_hi, (B, 2), jnp.float32, minval=0.60, maxval=0.95)
    roi_norms = jnp.concatenate([lo, hi], axis=1)               # [B, 4]
    focals = jnp.full((B, 1), 500.0, jnp.float32)

    params = init_params(jax.random.PRNGKey(42), d_img=C * H * W)

    blob = derenderer3d_forward(images, roi_norms, focals, params,
                                image_size=64, render_size=64)
    jax.block_until_ready(blob)

    # pure-JAX f32 reference for the derenderer MLP (bf16 streams in the kernel)
    img_flat = images.reshape(B, -1)
    mroi_ref = (roi_norms[:, 2:4] + roi_norms[:, 0:2]) / 2.0
    droi_ref = roi_norms[:, 2:4] - roi_norms[:, 0:2]
    roi_feats_ref = jnp.concatenate([mroi_ref, droi_ref], axis=1)
    h_ref = jnp.maximum(img_flat @ params["w1_img"]
                        + roi_feats_ref @ params["w1_roi"] + params["b1"], 0.0)
    heads_ref = np.asarray(h_ref @ params["w2"] + params["b2"])
    np.testing.assert_allclose(np.asarray(blob["_theta_deltas"]),
                               heads_ref[:, 8:10], rtol=1e-1, atol=5e-2)
    np.testing.assert_allclose(np.asarray(blob["_translation2ds"]),
                               heads_ref[:, 10:12], rtol=1e-1, atol=5e-2)
    np.testing.assert_allclose(np.asarray(blob["_log_scales"]),
                               heads_ref[:, 12:13], rtol=1e-1, atol=5e-2)
    np.testing.assert_allclose(np.asarray(blob["_log_depths"]),
                               heads_ref[:, 13:14], rtol=1e-1, atol=5e-2)
    np.testing.assert_allclose(np.asarray(blob["_ffd_coeffs"]),
                               heads_ref[:, 14:].reshape(B, NUM_CLASSES, FFD_DIM),
                               rtol=1e-1, atol=5e-2)
    np.testing.assert_allclose(np.asarray(blob["_class_probs"]),
                               np.asarray(jax.nn.softmax(
                                   jnp.asarray(heads_ref[:, :NUM_CLASSES]), axis=1)),
                               rtol=1e-1, atol=2e-2)

    # sanity: shapes match the PyTorch module's conventions
    assert blob["_mroi_norms"].shape == (B, 2)
    assert blob["_rotations"].shape == (B, 4)
    assert blob["_translations"].shape == (B, 3)
    assert blob["_class_probs"].shape == (B, NUM_CLASSES)
    assert blob["_ffd_coeffs"].shape == (B, NUM_CLASSES, FFD_DIM)
    assert blob["_class_log_probs"].shape == (B,)
    assert bool(jnp.all(jnp.isfinite(blob["_translations"])))

    print("KERNEL_OK")
</pallas_src>

<mosaic_0001>
module attributes {stable_mosaic.version = 11 : i64} {
  func.func @_fullk_kernel(%arg0: i32, %arg1: memref<8x128xf32, #tpu.memory_space<vmem>>, %arg2: memref<8x768xf32, #tpu.memory_space<vmem>>, %arg3: memref<768x128xbf16, #tpu.memory_space<vmem>>, %arg4: memref<128x128xbf16, #tpu.memory_space<vmem>>, %arg5: memref<1x128xf32, #tpu.memory_space<vmem>>, %arg6: memref<8x128xf32, #tpu.memory_space<vmem>>) attributes {dimension_semantics = [#tpu.dimension_semantics<parallel>], iteration_bounds = array<i64: 1>, scalar_prefetch = 0 : i64, scratch_operands = 0 : i64, tpu.core_type = #tpu.core_type<tc>, window_params = [{transform_indices = @transform_0, window_bounds = array<i64: 8, 128>}, {transform_indices = @transform_1, window_bounds = array<i64: 8, 768>}, {pipeline_mode = #tpu.pipeline_mode<synchronous>, transform_indices = @transform_2, window_bounds = array<i64: 768, 128>}, {pipeline_mode = #tpu.pipeline_mode<synchronous>, transform_indices = @transform_3, window_bounds = array<i64: 128, 128>}, {pipeline_mode = #tpu.pipeline_mode<synchronous>, transform_indices = @transform_4, window_bounds = array<i64: 1, 128>}, {transform_indices = @transform_5, window_bounds = array<i64: 8, 128>}]} {
    %c0 = arith.constant 0 : index
    %c0_0 = arith.constant 0 : index
    %0 = vector.load %arg1[%c0, %c0_0] : memref<8x128xf32, #tpu.memory_space<vmem>>, vector<8x128xf32>
    %c0_1 = arith.constant 0 : index
    %c0_2 = arith.constant 0 : index
    %1 = vector.load %arg2[%c0_1, %c0_2] : memref<8x768xf32, #tpu.memory_space<vmem>>, vector<8x768xf32>
    %2 = arith.truncf %1 : vector<8x768xf32> to vector<8x768xbf16>
    %c0_3 = arith.constant 0 : index
    %c0_4 = arith.constant 0 : index
    %3 = vector.load %arg3[%c0_3, %c0_4] : memref<768x128xbf16, #tpu.memory_space<vmem>>, vector<768x128xbf16>
    %cst = arith.constant dense<0.000000e+00> : vector<8x128xf32>
    %4 = tpu.matmul %2, %3, %cst {dimension_numbers = #tpu.dot_dimension_numbers<[1], [0], [0], [1], [0, 0, 1, 1], [], []>} : vector<8x768xbf16>, vector<768x128xbf16>, vector<8x128xf32> -> vector<8x128xf32>
    %5 = arith.addf %0, %4 : vector<8x128xf32>
    %cst_5 = arith.constant 0.000000e+00 : f32
    %6 = vector.broadcast %cst_5 : f32 to vector<8x128xf32>
    %7 = arith.maximumf %5, %6 : vector<8x128xf32>
    %8 = arith.truncf %7 : vector<8x128xf32> to vector<8x128xbf16>
    %c0_6 = arith.constant 0 : index
    %c0_7 = arith.constant 0 : index
    %9 = vector.load %arg4[%c0_6, %c0_7] : memref<128x128xbf16, #tpu.memory_space<vmem>>, vector<128x128xbf16>
    %cst_8 = arith.constant dense<0.000000e+00> : vector<8x128xf32>
    %10 = tpu.matmul %8, %9, %cst_8 {dimension_numbers = #tpu.dot_dimension_numbers<[1], [0], [0], [1], [0, 0, 1, 1], [], []>} : vector<8x128xbf16>, vector<128x128xbf16>, vector<8x128xf32> -> vector<8x128xf32>
    %c0_9 = arith.constant 0 : index
    %c0_10 = arith.constant 0 : index
    %11 = vector.load %arg5[%c0_9, %c0_10] : memref<1x128xf32, #tpu.memory_space<vmem>>, vector<1x128xf32>
    %12 = vector.broadcast %11 : vector<1x128xf32> to vector<8x128xf32>
    %13 = arith.addf %10, %12 : vector<8x128xf32>
    %c0_11 = arith.constant 0 : index
    %c0_12 = arith.constant 0 : index
    %14 = vector.load %arg6[%c0_11, %c0_12] : memref<8x128xf32, #tpu.memory_space<vmem>>, vector<8x128xf32>
    tpu.vector_store %arg6[%c0_11, %c0_12], %13 {strides = array<i32>} : memref<8x128xf32, #tpu.memory_space<vmem>>, vector<8x128xf32>,
    return
  }
  func.func @transform_0(%arg0: i32) -> (i32, i32) {
    %c0_i32 = arith.constant 0 : i32
    %c0_i32_0 = arith.constant 0 : i32
    return %arg0, %c0_i32 : i32, i32
  }
  func.func @transform_1(%arg0: i32) -> (i32, i32) {
    %c0_i32 = arith.constant 0 : i32
    %c0_i32_0 = arith.constant 0 : i32
    return %arg0, %c0_i32 : i32, i32
  }
  func.func @transform_2(%arg0: i32) -> (i32, i32) {
    %c0_i32 = arith.constant 0 : i32
    %c0_i32_0 = arith.constant 0 : i32
    %c0_i32_1 = arith.constant 0 : i32
    return %c0_i32, %c0_i32_0 : i32, i32
  }
  func.func @transform_3(%arg0: i32) -> (i32, i32) {
    %c0_i32 = arith.constant 0 : i32
    %c0_i32_0 = arith.constant 0 : i32
    %c0_i32_1 = arith.constant 0 : i32
    return %c0_i32, %c0_i32_0 : i32, i32
  }
  func.func @transform_4(%arg0: i32) -> (i32, i32) {
    %c0_i32 = arith.constant 0 : i32
    %c0_i32_0 = arith.constant 0 : i32
    %c0_i32_1 = arith.constant 0 : i32
    return %c0_i32, %c0_i32_0 : i32, i32
  }
  func.func @transform_5(%arg0: i32) -> (i32, i32) {
    %c0_i32 = arith.constant 0 : i32
    %c0_i32_0 = arith.constant 0 : i32
    return %arg0, %c0_i32 : i32, i32
  }
}

</mosaic_0001>

<bundles_post_ra>
// kernel: tpu_custom_call.1
= control target key start
LH: loop header
LB: loop body
LE: loop exit
PB: predicated region body
PF: predicated region fallthrough
CT: control target
= control target key end

     0   :  { %10 = vsyncpa [#allocation3], 0  ;;  %s1159_s0 = inlined_call_operand.hbm [shape: f32[8,128], index: 0, kind: input, shape index: {}]   ;;  %s1160_s1 = inlined_call_operand.hbm [shape: f32[8,768], index: 1, kind: input, shape index: {}]   ;;  %s1161_s2 = inlined_call_operand.hbm [shape: bf16[768,128], index: 2, kind: input, shape index: {}]   ;;  %s1162_s3 = inlined_call_operand.hbm [shape: bf16[128,128], index: 3, kind: input, shape index: {}]   ;;  %s1163_s4 = inlined_call_operand.vmem [shape: f32[1,128], index: 4, kind: input, shape index: {}]   ;;  %s1164_s5 = inlined_call_operand.hbm [shape: f32[8,128], index: 5, kind: output, shape index: {}]  }
   0x1   :  { %11 = vsyncpa [#allocation6], 0 }
   0x2   :  { %12 = vsyncpa [#allocation9], 0 }
   0x3   :  { %13 = vsyncpa [#allocation4], 0  ;;  %s1057_s18 = smov [#allocation5]   ;;  %s1058_s20 = smov [#allocation2]  }
   0x4   :  { %s30_s19 = sshll.u32 %s1057_s18, 4  ;;  %s20_s21 = sshll.u32 %s1058_s20, 4  ;;  %s31_s19 = int_to_ptr.vmem [resolvable:$true] %s30_s19  ;;  %s21_s21 = int_to_ptr.vmem [resolvable:$true] %s20_s21 }
   0x5   :  { %s939_s24 = scalar_lea.hbm %s1160_s1, 768 }
   0x6   :  { %p940_p0 = scmp.ne.s32.totalorder %s1160_s1, %s939_s24  ;;  %p943_p1 = scmp.lt.u32.totalorder %s939_s24, %s1160_s1 }
   0x8   :  { %p945_p2 = pnand %p943_p1, %p940_p0 }
   0xa   :  { %948 = shalt.err (!%p945_p2)
}
   0xb   :  { %s949_s29 = scalar_lea.vmem %s31_s19, 768  ;;  %p954_p4 = scmp.lt.s32.totalorder %s31_s19, %s31_s19 }
   0xc   :  { %p950_p3 = scmp.ne.s32.totalorder %s31_s19, %s949_s29  ;;  %p955_p5 = scmp.lt.s32.totalorder %s949_s29, %s949_s29 }
   0xe   :  { %p956_p6 = por %p955_p5, %p954_p4 }
  0x10   :  { %p957_p7 = pnand %p956_p6, %p950_p3 }
  0x12   :  { %960 = shalt.err (!%p957_p7)
}
  0x13   :  { %33 = dma.hbm_to_vmem [thread:$0]  %s1160_s1, 768, %s31_s19, [#allocation6]  }
  0x14   :  { %s961_s9 = scalar_lea.hbm %s1159_s0, 128 }
  0x15   :  { %p962_p8 = scmp.ne.s32.totalorder %s1159_s0, %s961_s9  ;;  %p965_p9 = scmp.lt.u32.totalorder %s961_s9, %s1159_s0 }
  0x17   :  { %p967_p10 = pnand %p965_p9, %p962_p8 }
  0x19   :  { %970 = shalt.err (!%p967_p10)
}
  0x1a   :  { %s971_s14 = scalar_lea.vmem %s21_s21, 128  ;;  %p976_p12 = scmp.lt.s32.totalorder %s21_s21, %s21_s21 }
  0x1b   :  { %p972_p11 = scmp.ne.s32.totalorder %s21_s21, %s971_s14  ;;  %p977_p13 = scmp.lt.s32.totalorder %s971_s14, %s971_s14 }
  0x1d   :  { %p978_p0 = por %p977_p13, %p976_p12 }
  0x1f   :  { %p979_p1 = pnand %p978_p0, %p972_p11 }
  0x21   :  { %982 = shalt.err (!%p979_p1)
}
  0x22   :  { %23 = dma.hbm_to_vmem [thread:$0]  %s1159_s0, 128, %s21_s21, [#allocation3]  }
  0x23   :  { %s1059_s16 = smov [#allocation7]   ;;  %s983_s20 = scalar_lea.hbm %s1161_s2, 6144 }
  0x24   :  { %s39_s17 = sshll.u32 %s1059_s16, 4  ;;  %p984_p2 = scmp.ne.s32.totalorder %s1161_s2, %s983_s20  ;;  %s40_s17 = int_to_ptr.vmem [resolvable:$true] %s39_s17 }
  0x25   :  { %p987_p3 = scmp.lt.u32.totalorder %s983_s20, %s1161_s2 }
  0x27   :  { %p989_p4 = pnand %p987_p3, %p984_p2 }
  0x29   :  { %992 = shalt.err (!%p989_p4)
}
  0x2a   :  { %s993_s26 = scalar_lea.vmem %s40_s17, 6144  ;;  %p998_p6 = scmp.lt.s32.totalorder %s40_s17, %s40_s17 }
  0x2b   :  { %p994_p5 = scmp.ne.s32.totalorder %s40_s17, %s993_s26  ;;  %p999_p7 = scmp.lt.s32.totalorder %s993_s26, %s993_s26 }
  0x2d   :  { %p1000_p8 = por %p999_p7, %p998_p6 }
  0x2f   :  { %p1001_p9 = pnand %p1000_p8, %p994_p5 }
  0x31   :  { %1004 = shalt.err (!%p1001_p9)
}
  0x32   :  { %s1060_s0 = smov 64   ;;  %s1061_s21 = smov 4  }
  0x33   :  { %45 = dma.hbm_to_vmem [thread:$0]  %s1161_s2, 6144, %s40_s17, [#allocation6], %s1060_s0, %s1060_s0, %s1061_s21  }
  0x34   :  { %s1062_s29 = smov [#allocation8]   ;;  %s1005_s8 = scalar_lea.hbm %s1162_s3, 1024 }
  0x35   :  { %s51_s30 = sshll.u32 %s1062_s29, 4  ;;  %p1006_p10 = scmp.ne.s32.totalorder %s1162_s3, %s1005_s8  ;;  %s52_s30 = int_to_ptr.vmem [resolvable:$true] %s51_s30 }
  0x36   :  { %p1009_p11 = scmp.lt.u32.totalorder %s1005_s8, %s1162_s3 }
  0x38   :  { %p1011_p12 = pnand %p1009_p11, %p1006_p10 }
  0x3a   :  { %1014 = shalt.err (!%p1011_p12)
}
  0x3b   :  { %s1015_s13 = scalar_lea.vmem %s52_s30, 1024  ;;  %p1020_p0 = scmp.lt.s32.totalorder %s52_s30, %s52_s30 }
  0x3c   :  { %p1016_p13 = scmp.ne.s32.totalorder %s52_s30, %s1015_s13  ;;  %p1021_p1 = scmp.lt.s32.totalorder %s1015_s13, %s1015_s13 }
  0x3e   :  { %p1022_p2 = por %p1021_p1, %p1020_p0 }
  0x40   :  { %p1023_p3 = pnand %p1022_p2, %p1016_p13 }
  0x42   :  { %1026 = shalt.err (!%p1023_p3)
}
  0x43   :  { %57 = dma.hbm_to_vmem [thread:$0]  %s1162_s3, 1024, %s52_s30, [#allocation9], %s1060_s0, %s1060_s0, %s1061_s21  }
  0x44   :  { %1049 = dma.done.wait [#allocation3], 128  }
  0x45   :  { %1050 = vsyncadd [#allocation3], 4294967168 }
  0x46   :  { %1051 = dma.done.wait [#allocation6], 6912  }
  0x47   :  { %1052 = vsyncadd [#allocation6], 4294960384 }
  0x48   :  { %1053 = dma.done.wait [#allocation9], 1024  }
  0x49   :  { %1054 = vsyncadd [#allocation9], 4294966272  ;;  %v883_v0 = vld [vmem:[#allocation7 + $0x40] sm:$0xff]   ;;  %v887_v4 = vld [vmem:[#allocation7 + $0x48] sm:$0xff]   ;;  %v1063_v61 = vmov 0.0   ;;  %vm1064_vm0 = vmmov 0  }
  0x4a   :  { %v884_v1 = vld [vmem:[#allocation7 + $0xc0] sm:$0xff]   ;;  %779 = vmatprep.subr.bf16.mxu0 %v883_v0  ;;  %v888_v5 = vld [vmem:[#allocation7 + $0xc8] sm:$0xff]   ;;  %v891_v8 = vld [vmem:[#allocation7 + $0x50] sm:$0xff]   ;;  %s1065_s15 = smov [#allocation10]  }
  0x4b   :  { %v885_v2 = vld [vmem:[#allocation7] sm:$0xff]   ;;  %801 = vmatprep.subr.bf16.mxu1 %v884_v1  ;;  %v889_v6 = vld [vmem:[#allocation7 + $0x8] sm:$0xff]   ;;  %v892_v9 = vld [vmem:[#allocation7 + $0xd0] sm:$0xff]   ;;  %s711_s16 = sshll.u32 %s1065_s15, 4  ;;  %s712_s16 = int_to_ptr.vmem [resolvable:$true] %s711_s16 }
  0x4c   :  { %v886_v3 = vld [vmem:[#allocation7 + $0x80] sm:$0xff]   ;;  %780 = vmatpush3.bf16.msra.mxu0 %v885_v2  ;;  %v890_v7 = vld [vmem:[#allocation7 + $0x88] sm:$0xff]   ;;  %v893_v10 = vld [vmem:[#allocation7 + $0x10] sm:$0xff]   ;;  %s1027_s17 = scalar_lea.vmem %s712_s16, 128  ;;  %p1032_p5 = scmp.lt.s32.totalorder %s712_s16, %s712_s16 }
  0x4d   :  { %802 = vmatpush3.bf16.msra.mxu1 %v886_v3  ;;  %781 = vmatprep.subr.bf16.mxu0 %v887_v4  ;;  %v894_v11 = vld [vmem:[#allocation7 + $0x90] sm:$0xff]   ;;  %v895_v12 = vld [vmem:[#allocation7 + $0x58] sm:$0xff]   ;;  %v899_v16 = vld [vmem:[#allocation7 + $0x60] sm:$0xff]   ;;  %p1028_p4 = scmp.ne.s32.totalorder %s712_s16, %s1027_s17  ;;  %p1033_p6 = scmp.lt.s32.totalorder %s1027_s17, %s1027_s17 }
  0x4e   :  { %803 = vmatprep.subr.bf16.mxu1 %v888_v5  ;;  %v896_v13 = vld [vmem:[#allocation7 + $0xd8] sm:$0xff]   ;;  %v900_v17 = vld [vmem:[#allocation7 + $0xe0] sm:$0xff]   ;;  %v903_v20 = vld [vmem:[#allocation7 + $0x68] sm:$0xff]  }
  0x4f   :  { %v897_v14 = vld [vmem:[#allocation7 + $0x18] sm:$0xff]   ;;  %v901_v18 = vld [vmem:[#allocation7 + $0x20] sm:$0xff]   ;;  %v904_v21 = vld [vmem:[#allocation7 + $0xe8] sm:$0xff]   ;;  %p1034_p7 = por %p1033_p6, %p1032_p5 }
  0x50   :  { %782 = vmatpush3.bf16.msra.mxu0 %v889_v6  ;;  %v898_v15 = vld [vmem:[#allocation7 + $0x98] sm:$0xff]   ;;  %v902_v19 = vld [vmem:[#allocation7 + $0xa0] sm:$0xff]   ;;  %v905_v22 = vld [vmem:[#allocation7 + $0x28] sm:$0xff]  }
  0x51   :  { %804 = vmatpush3.bf16.msra.mxu1 %v890_v7  ;;  %783 = vmatprep.subr.bf16.mxu0 %v891_v8  ;;  %v906_v23 = vld [vmem:[#allocation7 + $0xa8] sm:$0xff]   ;;  %v907_v24 = vld [vmem:[#allocation7 + $0x70] sm:$0xff]   ;;  %v911_v28 = vld [vmem:[#allocation7 + $0x78] sm:$0xff]   ;;  %p1035_p8 = pnand %p1034_p7, %p1028_p4 }
  0x52   :  { %805 = vmatprep.subr.bf16.mxu1 %v892_v9  ;;  %v908_v25 = vld [vmem:[#allocation7 + $0xf0] sm:$0xff]   ;;  %v912_v29 = vld [vmem:[#allocation7 + $0xf8] sm:$0xff]   ;;  %v77_v33 = vld [vmem:[#allocation5 + $0x18] sm:$0xff] }
  0x53   :  { %v909_v26 = vld [vmem:[#allocation7 + $0x30] sm:$0xff]   ;;  %v913_v30 = vld [vmem:[#allocation7 + $0x38] sm:$0xff]   ;;  %v83_v36 = vpack.c.bf16 %v77_v33, %v77_v33  ;;  %v76_v38 = vld [vmem:[#allocation5 + $0x10] sm:$0xff] }
  0x54   :  { %784 = vmatpush3.bf16.msra.mxu0 %v893_v10  ;;  %v910_v27 = vld [vmem:[#allocation7 + $0xb0] sm:$0xff]   ;;  %v914_v31 = vld [vmem:[#allocation7 + $0xb8] sm:$0xff]   ;;  %v82_v39 = vpack.c.bf16 %v76_v38, %v76_v38  ;;  %v915_v40 = vld [vmem:[#allocation7 + $0x140] sm:$0xff]  }
  0x55   :  { %806 = vmatpush3.bf16.msra.mxu1 %v894_v11  ;;  %785 = vmatprep.subr.bf16.mxu0 %v895_v12  ;;  %v75_v32 = vld [vmem:[#allocation5 + $0x8] sm:$0xff]  ;;  %v74_v34 = vld [vmem:[#allocation5] sm:$0xff]  ;;  %v916_v41 = vld [vmem:[#allocation7 + $0x100] sm:$0xff]  }
  0x56   :  { %807 = vmatprep.subr.bf16.mxu1 %v896_v13  ;;  %v81_v35 = vpack.c.bf16 %v75_v32, %v75_v32  ;;  %v80_v37 = vpack.c.bf16 %v74_v34, %v74_v34  ;;  %542 = vmatprep.mubr.bf16.mxu1 %v83_v36  ;;  %v917_v42 = vld [vmem:[#allocation7 + $0x148] sm:$0xff]   ;;  %v919_v44 = vld [vmem:[#allocation7 + $0x150] sm:$0xff]   ;;  %v921_v46 = vld [vmem:[#allocation7 + $0x158] sm:$0xff]  }
  0x57   :  { %v918_v43 = vld [vmem:[#allocation7 + $0x108] sm:$0xff]   ;;  %v920_v45 = vld [vmem:[#allocation7 + $0x110] sm:$0xff]   ;;  %v922_v47 = vld [vmem:[#allocation7 + $0x118] sm:$0xff]  }
  0x58   :  { %786 = vmatpush3.bf16.msra.mxu0 %v897_v14  ;;  %502 = vmatprep.mubr.bf16.mxu0 %v81_v35  ;;  %v923_v48 = vld [vmem:[#allocation7 + $0x160] sm:$0xff]   ;;  %v925_v50 = vld [vmem:[#allocation7 + $0x168] sm:$0xff]   ;;  %v79_v51 = vld [vmem:[#allocation5 + $0x28] sm:$0xff] }
  0x59   :  { %808 = vmatpush3.bf16.msra.mxu1 %v898_v15  ;;  %787 = vmatprep.subr.bf16.mxu0 %v899_v16  ;;  %v924_v49 = vld [vmem:[#allocation7 + $0x120] sm:$0xff]   ;;  %v85_v52 = vpack.c.bf16 %v79_v51, %v79_v51  ;;  %v926_v53 = vld [vmem:[#allocation7 + $0x128] sm:$0xff]   ;;  %v927_v54 = vld [vmem:[#allocation7 + $0x170] sm:$0xff]  }
  0x5a   :  { %809 = vmatprep.subr.bf16.mxu1 %v900_v17  ;;  %v928_v55 = vld [vmem:[#allocation7 + $0x130] sm:$0xff]   ;;  %v929_v56 = vld [vmem:[#allocation7 + $0x178] sm:$0xff]   ;;  %v931_v60 = vld [vmem:[#allocation8] sm:$0xff]  }
  0x5b   :  { %v930_v57 = vld [vmem:[#allocation7 + $0x138] sm:$0xff]   ;;  %v78_v58 = vld [vmem:[#allocation5 + $0x20] sm:$0xff]  ;;  %v932_v62 = vld [vmem:[#allocation8 + $0x8] sm:$0xff]  }
  0x5c   :  { %788 = vmatpush3.bf16.msra.mxu0 %v901_v18  ;;  %v84_v59 = vpack.c.bf16 %v78_v58, %v78_v58  ;;  %v933_v63 = vld [vmem:[#allocation8 + $0x10] sm:$0xff]   ;;  %v934_v0 = vld [vmem:[#allocation8 + $0x18] sm:$0xff]   ;;  %v935_v1 = vld [vmem:[#allocation8 + $0x20] sm:$0xff]  }
  0x5d   :  { %810 = vmatpush3.bf16.msra.mxu1 %v902_v19  ;;  %789 = vmatprep.subr.bf16.mxu0 %v903_v20  ;;  %v936_v2 = vld [vmem:[#allocation8 + $0x28] sm:$0xff]   ;;  %v937_v3 = vld [vmem:[#allocation8 + $0x30] sm:$0xff]   ;;  %v938_v4 = vld [vmem:[#allocation8 + $0x38] sm:$0xff]  }
  0x5e   :  { %811 = vmatprep.subr.bf16.mxu1 %v904_v21  ;;  %v73_v20 = vld [vmem:[#allocation2] sm:$0xff] }
  0x60   :  { %790 = vmatpush3.bf16.msra.mxu0 %v905_v22 }
  0x61   :  { %812 = vmatpush3.bf16.msra.mxu1 %v906_v23  ;;  %791 = vmatprep.subr.bf16.mxu0 %v907_v24 }
  0x62   :  { %813 = vmatprep.subr.bf16.mxu1 %v908_v25 }
  0x64   :  { %792 = vmatpush3.bf16.msra.mxu0 %v909_v26  ;;  %v770_v26 = vld [vmem:[%s1163_s4] ss:$0 sm:$0xff] }
  0x65   :  { %814 = vmatpush3.bf16.msra.mxu1 %v910_v27  ;;  %793 = vmatprep.subr.bf16.mxu0 %v911_v28 }
  0x66   :  { %815 = vmatprep.subr.bf16.mxu1 %v912_v29 }
  0x68   :  { %794 = vmatpush3.bf16.msra.mxu0 %v913_v30 }
  0x69   :  { %816 = vmatpush3.bf16.msra.mxu1 %v914_v31  ;;  %823 = vmatprep.subr.bf16.mxu0 %v915_v40 }
  0x6a   :  { %854 = vmatprep.subr.bf16.mxu1 %v1063_v61 }
  0x6b   :  { %503 = vmatmul.mubr.bf16.vlgmr.msra.gmra.mrb[0].mxu0 %v80_v37 }
  0x6c   :  { %543 = vmatmul.mubr.bf16.vlgmr.msra.gmra.mrb[0].mxu1 %v82_v39  ;;  %824 = vmatpush3.bf16.msra.mxu0 %v916_v41 }
  0x6d   :  { %825 = vmatprep.subr.bf16.mxu0 %v917_v42  ;;  %582 = vmatprep.mubr.bf16.mxu0 %v85_v52 }
  0x6e   :  { %855 = vmatpush3.bf16.msra.mxu1 %v931_v60  ;;  %870 = vmatprep.mubr.msk.bf16.mxu1 %vm1064_vm0, %v1063_v61 }
  0x6f   :  { %856 = vmatprep.subr.bf16.mxu1 %v1063_v61 }
  0x70   :  { %826 = vmatpush3.bf16.msra.mxu0 %v918_v43 }
  0x71   :  { %827 = vmatprep.subr.bf16.mxu0 %v919_v44 }
  0x72   :  { %857 = vmatpush3.bf16.msra.mxu1 %v932_v62 }
  0x73   :  { %858 = vmatprep.subr.bf16.mxu1 %v1063_v61 }
  0x74   :  { %828 = vmatpush3.bf16.msra.mxu0 %v920_v45 }
  0x75   :  { %829 = vmatprep.subr.bf16.mxu0 %v921_v46 }
  0x76   :  { %859 = vmatpush3.bf16.msra.mxu1 %v933_v63 }
  0x77   :  { %860 = vmatprep.subr.bf16.mxu1 %v1063_v61 }
  0x78   :  { %830 = vmatpush3.bf16.msra.mxu0 %v922_v47 }
  0x79   :  { %831 = vmatprep.subr.bf16.mxu0 %v923_v48 }
  0x7a   :  { %861 = vmatpush3.bf16.msra.mxu1 %v934_v0 }
  0x7b   :  { %862 = vmatprep.subr.bf16.mxu1 %v1063_v61 }
  0x7c   :  { %832 = vmatpush3.bf16.msra.mxu0 %v924_v49 }
  0x7d   :  { %833 = vmatprep.subr.bf16.mxu0 %v925_v50 }
  0x7e   :  { %863 = vmatpush3.bf16.msra.mxu1 %v935_v1 }
  0x7f   :  { %864 = vmatprep.subr.bf16.mxu1 %v1063_v61 }
  0x80   :  { %834 = vmatpush3.bf16.msra.mxu0 %v926_v53 }
  0x81   :  { %835 = vmatprep.subr.bf16.mxu0 %v927_v54 }
  0x82   :  { %865 = vmatpush3.bf16.msra.mxu1 %v936_v2 }
  0x83   :  { %866 = vmatprep.subr.bf16.mxu1 %v1063_v61 }
  0x84   :  { %836 = vmatpush3.bf16.msra.mxu0 %v928_v55 }
  0x85   :  { %837 = vmatprep.subr.bf16.mxu0 %v929_v56 }
  0x86   :  { %867 = vmatpush3.bf16.msra.mxu1 %v937_v3 }
  0x87   :  { %868 = vmatprep.subr.bf16.mxu1 %v1063_v61 }
  0x88   :  { %838 = vmatpush3.bf16.msra.mxu0 %v930_v57 }
  0x8a   :  { %869 = vmatpush3.bf16.msra.mxu1 %v938_v4 }
  0x8b   :  { %583 = vmatmul.mubr.bf16.vlgmr.msra.gmra.mrb[4].mxu0 %v84_v59 }
 0x13e   :  { %v795_v5 = vpop.f32.mrb[0].mxu0 }
 0x13f   :  { %v817_v6 = vpop.f32.mrb[0].mxu1  ;;  %v796_v7 = vpop.f32.mrb[1].mxu0 }
 0x140   :  { %v818_v8 = vpop.f32.mrb[1].mxu1  ;;  %v797_v9 = vadd.f32 %v796_v7, %v795_v5  ;;  %v798_v11 = vpop.f32.mrb[2].mxu0 }
 0x141   :  { %v819_v10 = vadd.f32 %v818_v8, %v817_v6  ;;  %v820_v12 = vpop.f32.mrb[2].mxu1  ;;  %v799_v13 = vpop.f32.mrb[3].mxu0 }
 0x142   :  { %v821_v14 = vpop.f32.mrb[3].mxu1 }
 0x143   :  { %v545_v15 = vadd.f32 %v819_v10, %v797_v9 }
 0x15e   :  { %v839_v16 = vpop.f32.mrb[4].mxu0 }
 0x15f   :  { %v840_v17 = vpop.f32.mrb[5].mxu0 }
 0x160   :  { %v841_v18 = vadd.f32 %v840_v17, %v839_v16  ;;  %v842_v19 = vpop.f32.mrb[6].mxu0 }
 0x161   :  { %v843_v21 = vpop.f32.mrb[7].mxu0 }
 0x162   :  { %v585_v22 = vadd.f32 %v841_v18, %v545_v15 }
 0x164   :  { %v590_v23 = vadd.f32 %v585_v22, %v73_v20 }
 0x166   :  { %v591_v24 = vmax.f32 %v590_v23, 0.0 }
 0x168   :  { %v592_v25 = vpack.c.bf16 %v591_v24, %v591_v24 }
 0x16a   :  { %871 = vmatmul.mubr.bf16.vlgmr.msra.gmra.mrb[4].mxu1 %v592_v25 }
 0x23d   :  { %v698_v27 = vpop.f32.mrb[4].mxu1 }
 0x23e   :  { %v699_v28 = vadd.f32 %v770_v26, %v698_v27  ;;  %v872_v29 = vpop.f32.mrb[5].mxu1 }
 0x23f   :  { %v701_v30 = vpop.f32.mrb[6].mxu1 }
 0x240   :  { %704 = vst [vmem:[#allocation10] sm:$0xff] %v699_v28  ;;  %v873_v31 = vpop.f32.mrb[7].mxu1 }
 0x241   :  { %1038 = shalt.err (!%p1035_p8)
}
 0x242   :  { %s1039_s4 = scalar_lea.hbm %s1164_s5, 128 }
 0x243   :  { %p1040_p9 = scmp.ne.s32.totalorder %s1164_s5, %s1039_s4  ;;  %p1043_p10 = scmp.lt.u32.totalorder %s1039_s4, %s1164_s5 }
 0x245   :  { %p1045_p11 = pnand %p1043_p10, %p1040_p9 }
 0x247   :  { %1048 = shalt.err (!%p1045_p11)
}
 0x248   :  { %714 = dma.vmem_to_hbm [thread:$0]  %s712_s16, 128, %s1164_s5, [#allocation4]  }
 0x249   :  { %1055 = dma.done.wait [#allocation4], 128  }
 0x24a   :  { %1056 = vsyncadd [#allocation4], 4294967168 }
 0x24b   :  { %718 = vsyncpa [#allocation3], 1 }
 0x24c   :  { %719 = vsyncpa [#allocation6], 1 }
 0x24d   :  { %720 = vsyncpa [#allocation9], 1 }
 0x24e   :  { %721 = vsyncpa [#allocation4], 1 }

</bundles_post_ra>
